<compile_context>
chip_gen: v7x
topology: tpu7x:2x2x1
jax: 0.10.0
libtpu: 0.0.40
codegen_flags: <defaults>
</compile_context>

<pallas_src>
import jax
import jax.numpy as jnp
from jax.experimental import pallas as pl
from jax.experimental.pallas import tpu as pltpu


def _round_up(n, m):
    return ((n + m - 1) // m) * m


def _round_down(n, m):
    return (n // m) * m


def _row_norm_kernel(scale_ref, x_ref, o_ref):
    # x_ref/o_ref: (tb, D) tile, features on lanes -> per-row reduction over lanes.
    x = x_ref[...]
    xf = x.astype(jnp.float32)
    sq = jnp.sum(xf * xf, axis=-1, keepdims=True)        # (tb, 1) f32 accumulate
    inv = scale_ref[0] * jax.lax.rsqrt(sq)               # scale * 1/||x|| (EUP rsqrt)
    o_ref[...] = (xf * inv).astype(o_ref.dtype)          # single full-width VPU multiply


def normalization_layer(x, norm_scale, *, block=None):
    """L2-normalize rows of x (B, D) over dim=1 and scale by norm_scale (shape (1,))."""
    B, D = x.shape
    dtype = x.dtype
    itemsize = jnp.dtype(dtype).itemsize
    # Dtype-aware sublane rounding: packed dtypes need taller minimum tiles.
    sub = {1: 32, 2: 16}.get(itemsize, 8)

    # norm_scale is kept in f32 so the whole norm/scale computation stays in f32.
    scale = jnp.asarray(norm_scale, dtype=jnp.float32).reshape((1,))

    # Generation-aware VMEM budget (v7x: 64 MiB physical, v5e/v6e: 128 MiB).
    try:
        info = pltpu.get_tpu_info()
        phys_vmem = int(getattr(info, "vmem_capacity_bytes", 64 << 20))
    except Exception:  # pragma: no cover - conservative fallback off-TPU
        phys_vmem = 64 << 20
    vmem_limit = min(phys_vmem * 3 // 4, 100 << 20)

    # Bytes-based tile sizing.  Live footprint per step is roughly
    # 2 arrays x 2 pipeline buffers x tile (+ f32 temps in vregs / compiler scratch),
    # so target ~1/5 of the limit per tile, capped at 12 MiB.
    row_bytes = D * itemsize
    target_tile_bytes = min(12 << 20, vmem_limit // 5)
    auto_tb = _round_down(max(target_tile_bytes // row_bytes, sub), sub)
    if block is None:
        tb = auto_tb
    else:
        tb = _round_up(max(int(block), sub), sub)
        tb = min(tb, auto_tb)                      # never blow the VMEM budget
    # Keep at least ~4 grid steps when B allows (megacore sharding + pipelining).
    tb = min(tb, max(sub, _round_up(pl.cdiv(B, 4), sub)))
    # Don't exceed the (sublane-rounded) batch.
    tb = min(tb, _round_up(B, sub))

    grid = (pl.cdiv(B, tb),)                       # ragged trailing block, no padding

    return pl.pallas_call(
        _row_norm_kernel,
        out_shape=jax.ShapeDtypeStruct((B, D), dtype),
        grid=grid,
        in_specs=[
            pl.BlockSpec(memory_space=pltpu.MemorySpace.SMEM),   # norm_scale (1,) f32
            pl.BlockSpec((tb, D), lambda i: (i, 0)),
        ],
        out_specs=pl.BlockSpec((tb, D), lambda i: (i, 0)),
        compiler_params=pltpu.CompilerParams(
            dimension_semantics=("parallel",),
            vmem_limit_bytes=vmem_limit,
        ),
    )(scale, x)


def _reference(x, norm_scale):
    norm = jnp.linalg.norm(x.astype(jnp.float32), axis=1, keepdims=True)
    return (jnp.float32(norm_scale[0]) * x.astype(jnp.float32) / norm).astype(x.dtype)


if __name__ == "__main__":
    key = jax.random.PRNGKey(0)

    # Parameter init matches torch.nn.Parameter(torch.FloatTensor((1.0,)))
    norm_scale = jnp.array([1.0], dtype=jnp.float32)

    ok = True
    cases = [
        (16, 256),   # lane-dense feature dim, grid > 1
        (10, 48),    # lane-sparse D (< 128) + ragged trailing block
        (37, 128),   # B not a multiple of the tile -> masked trailing stores
    ]
    for idx, (B, D) in enumerate(cases):
        key, k = jax.random.split(key)
        x = jax.random.normal(k, (B, D), dtype=jnp.float32)
        out = jax.block_until_ready(normalization_layer(x, norm_scale))
        ref = _reference(x, norm_scale)
        ok &= bool(jnp.allclose(out, ref, atol=1e-5, rtol=1e-5))
        ok &= out.shape == (B, D)

    assert ok, "mismatch vs reference"
    print("KERNEL_OK")
</pallas_src>

<mosaic_0001>
module attributes {stable_mosaic.version = 11 : i64} {
  func.func @_row_norm_kernel(%arg0: i32, %arg1: memref<1xf32, #tpu.memory_space<smem>>, %arg2: memref<8x256xf32, #tpu.memory_space<vmem>>, %arg3: memref<8x256xf32, #tpu.memory_space<vmem>>) attributes {dimension_semantics = [#tpu.dimension_semantics<parallel>], iteration_bounds = array<i64: 2>, scalar_prefetch = 0 : i64, scratch_operands = 0 : i64, tpu.core_type = #tpu.core_type<tc>, window_params = [{transform_indices = @transform_0, window_bounds = array<i64: 1>}, {transform_indices = @transform_1, window_bounds = array<i64: 8, 256>}, {transform_indices = @transform_2, window_bounds = array<i64: 8, 256>}]} {
    %c0 = arith.constant 0 : index
    %c0_0 = arith.constant 0 : index
    %0 = vector.load %arg2[%c0, %c0_0] : memref<8x256xf32, #tpu.memory_space<vmem>>, vector<8x256xf32>
    %1 = arith.mulf %0, %0 : vector<8x256xf32>
    %cst = arith.constant dense<0.000000e+00> : vector<8xf32>
    %2 = vector.multi_reduction <add>, %1, %cst [1] : vector<8x256xf32> to vector<8xf32>
    %3 = vector.shape_cast %2 : vector<8xf32> to vector<8x1xf32>
    %c0_1 = arith.constant 0 : index
    %4 = memref.load %arg1[%c0_1] : memref<1xf32, #tpu.memory_space<smem>>
    %5 = math.rsqrt %3 : vector<8x1xf32>
    %6 = vector.broadcast %4 : f32 to vector<8x1xf32>
    %7 = arith.mulf %6, %5 : vector<8x1xf32>
    %8 = vector.broadcast %7 : vector<8x1xf32> to vector<8x256xf32>
    %9 = arith.mulf %0, %8 : vector<8x256xf32>
    %c0_2 = arith.constant 0 : index
    %c0_3 = arith.constant 0 : index
    %10 = vector.load %arg3[%c0_2, %c0_3] : memref<8x256xf32, #tpu.memory_space<vmem>>, vector<8x256xf32>
    tpu.vector_store %arg3[%c0_2, %c0_3], %9 {strides = array<i32>} : memref<8x256xf32, #tpu.memory_space<vmem>>, vector<8x256xf32>,
    return
  }
  func.func @transform_0(%arg0: i32) -> i32 {
    %c0_i32 = arith.constant 0 : i32
    %c0_i32_0 = arith.constant 0 : i32
    return %c0_i32 : i32
  }
  func.func @transform_1(%arg0: i32) -> (i32, i32) {
    %c0_i32 = arith.constant 0 : i32
    %c0_i32_0 = arith.constant 0 : i32
    return %arg0, %c0_i32 : i32, i32
  }
  func.func @transform_2(%arg0: i32) -> (i32, i32) {
    %c0_i32 = arith.constant 0 : i32
    %c0_i32_0 = arith.constant 0 : i32
    return %arg0, %c0_i32 : i32, i32
  }
}

</mosaic_0001>

<bundles_post_ra>
// kernel: tpu_custom_call.1
= control target key start
LH: loop header
LB: loop body
LE: loop exit
PB: predicated region body
PF: predicated region fallthrough
CT: control target
= control target key end

     0   :  { %s604_s0 = inlined_call_operand.<no memory space> [shape: f32[1], index: 0, kind: input, shape index: {}]   ;;  %s605_s1 = inlined_call_operand.hbm [shape: f32[16,256], index: 1, kind: input, shape index: {}]   ;;  %s606_s2 = inlined_call_operand.hbm [shape: f32[16,256], index: 2, kind: output, shape index: {}]  }
   0x1   :  { %7 = sst [smem:[#allocation2]] %s604_s0 }
   0x2   :  { %8 = vsyncpa [#allocation4], 0 }
   0x3   :  { %10 = vsyncpa [#allocation4 + $0x1], 0 }
   0x4   :  { %11 = vsyncpa [#allocation5], 0 }
   0x5   :  { %13 = vsyncpa [#allocation5 + $0x1], 0  ;;  %s443_s11 = smov 0   ;;  %s445_s12 = smov 0  }
   0x6   :  { %s447_s13 = smov 0   ;;  %s449_s14 = smov 0  }
   0x7 LB: > { %s464_s0 = sadd.s32 4294967295, %s421_s14   ;;  %s261_s15 = sadd.s32 4294967294, %s421_s14   ;;  %s421_s14 = sphi %s449_s14, %s621_s14   ;;  %s417_s13 = sphi %s447_s13, %s620_s13   ;;  %s413_s12 = sphi %s445_s12, %s619_s12   ;;  %s409_s11 = sphi %s443_s11, %s618_s11  }
   0x8   : > { %s468_s16 = sadd.s32 1, %s421_s14   ;;  %s47_s17 = sadd.s32 1, %s417_s13 }
   0x9   : > { %s44_s18 = ssub.s32 %s421_s14, %s468_s16  ;;  %p54_p0 = scmp.ne.s32.totalorder %s417_s13, %s413_s12 }
   0xa   : > { %p45_p1 = scmp.eq.s32.totalorder %s44_s18, 0  ;;  %p55_p2 = scmp.eq.s32.totalorder %s421_s14, 0 }
   0xb   : > { %p60_p3 = scmp.ne.s32.totalorder %s413_s12, %s409_s11  ;;  %p61_p4 = scmp.eq.s32.totalorder %s464_s0, 0 }
   0xc   : > { %s480_s19 = scalar_select %p45_p1, %s417_s13, %s47_s17  }
   0xd   : > { %p482_p5 = por %p55_p2, %p54_p0  ;;  %p486_p6 = por %p61_p4, %p60_p3 }
   0xe   : > { %p84_p7 = scmp.eq.s32.totalorder %s464_s0, 1  ;;  %p90_p8 = scmp.eq.s32.totalorder %s261_s15, 1 }
   0xf   : > { %p289_p10 = scmp.lt.s32.totalorder %s421_s14, 2  ;;  %s113_s24 = sand.u32 1, %s417_s13  }
  0x10   : > { %p493_p11 = por %p84_p7, %p54_p0  ;;  %p497_p12 = por %p90_p8, %p60_p3 }
  0x11   : > { %s275_s25 = sshll.u32 %s421_s14, 8  ;;  %s264_s26 = sshll.u32 %s113_s24, 4 }
  0x12   : > { %s610_s22 = scalar_select %p493_p11, 1, 0 }
  0x13   : > { %s611_s23 = scalar_select %p497_p12, 1, 0 }
  0x14   : > { %s506_s29 = scalar_lea.hbm %s605_s1, %s275_s25  ;;  %s117_s30 = scalar_lea.vmem [#allocation3], %s264_s26 }
  0x15   : > { %s125_s3 = sshll.u32 %s117_s30, 4  ;;  %p510_p13 = pnand %p289_p10, %p482_p5  ;;  %s514_s3 = int_to_ptr.vmem [resolvable:$true] %s125_s3 }
  0x16   : > { %s114_s5 = scalar_lea.sflag [#allocation4], %s113_s24  ;;  %s325_s6 = scalar_lea.hbm %s506_s29, 256 }
  0x17   : > { %p326_p2 = scmp.ne.s32.totalorder %s506_s29, %s325_s6  ;;  %p327_p3 = pneg %p510_p13 }
  0x18   : > { %s330_s9 = scalar_lea.hbm %s605_s1, 512  ;;  %p331_p5 = scmp.lt.u32.totalorder %s506_s29, %s605_s1 }
  0x19   : > { %p328_p4 = pnand %p327_p3, %p326_p2  ;;  %p332_p8 = scmp.lt.u32.totalorder %s330_s9, %s325_s6 }
  0x1a   : > { %p334_p9 = scmp.lt.u32.totalorder %s325_s6, %s506_s29 }
  0x1b   : > { %p329_p7 = pneg %p328_p4  ;;  %p333_p10 = por %p332_p8, %p331_p5 }
  0x1d   : > { %p335_p0 = por %p334_p9, %p333_p10 }
  0x1f   : > { %p336_p1 = pnand %p335_p0, %p329_p7 }
  0x21   : > { %339 = shalt.err (!%p336_p1)
}
  0x22   : > { %s340_s17 = scalar_lea.vmem %s514_s3, 256  ;;  %s423_s18 = smov [#allocation3]  }
  0x23   : > { %p341_p2 = scmp.ne.s32.totalorder %s514_s3, %s340_s17  ;;  %s345_s20 = sshll.u32 %s423_s18, 4  ;;  %s346_s20 = int_to_ptr.vmem [resolvable:$false] %s345_s20 }
  0x24   : > { %s347_s24 = scalar_lea.vmem %s346_s20, 512  ;;  %p348_p11 = scmp.lt.s32.totalorder %s514_s3, %s346_s20 }
  0x25   : > { %p343_p4 = pnand %p341_p2, %p327_p3  ;;  %p349_p5 = scmp.lt.s32.totalorder %s347_s24, %s340_s17 }
  0x27   : > { %p344_p12 = pneg %p343_p4  ;;  %p350_p8 = por %p349_p5, %p348_p11 }
  0x29   : > { %p351_p9 = pnand %p350_p8, %p344_p12 }
  0x2b   : > { %354 = shalt.err (!%p351_p9)
}
  0x2c   : > { %284 = dma.hbm_to_vmem [thread:$0]  (!%p510_p13), %s506_s29, 256, %s514_s3, %s114_s5  }
  0x2d   : > { %p613_p0 = scmp.lt.s32.totalorder %s421_s14, 3  ;;  %p614_p1 = scmp.ge.s32.totalorder %s421_s14, 1 }
  0x2f   : > { %p131_p3 = pnand %p614_p1, %p613_p0 }
  0x30   : > { %s548_s25 = sand.u32 (!%p131_p3), 1, %s413_s12  }
  0x31   : > { %134 = sbr.rel (%p131_p3) target bundleno = 233 (0xe9), region = 28  ;;  %s268_s26 = sshll.u32 (!%p131_p3), %s548_s25, 4 }
  0x32   : > { %s137_s27 = scalar_lea.sflag (!%p131_p3), [#allocation4], %s548_s25  ;;  %s140_s28 = scalar_lea.vmem (!%p131_p3), [#allocation3], %s268_s26 }
  0x38   : > { %400 = dma.done.wait (%p486_p6), %s137_s27, 256  }
  0x39   : > { %402 = vsyncadd (%p486_p6), %s137_s27, 4294967040  ;;  %v161_v0 = vld [vmem:[%s140_s28] sm:$0xff]  ;;  %v162_v1 = vld [vmem:[%s140_s28 + $0x8] sm:$0xff]  ;;  %s168_s29 = sld [smem:[#allocation2]]  ;;  %s276_s30 = sshll.u32 %s464_s0, 8 }
  0x3a   : > { %v163_v2 = vmul.f32 %v161_v0, %v161_v0  ;;  %v164_v3 = vmul.f32 %v162_v1, %v162_v1  ;;  %s160_s3 = scalar_lea.vmem [#allocation6], %s268_s26  ;;  %s560_s6 = scalar_lea.hbm %s606_s2, %s276_s30 }
  0x3b   : > { %s191_s4 = sshll.u32 %s160_s3, 4  ;;  %s177_s7 = scalar_lea.sflag [#allocation5], %s548_s25  ;;  %s562_s4 = int_to_ptr.vmem [resolvable:$true] %s191_s4 }
  0x3c   : > { %v165_v4 = vadd.f32 %v164_v3, %v163_v2  ;;  %s355_s8 = scalar_lea.vmem %s562_s4, 256  ;;  %p615_p11 = scmp.ne.s32.totalorder %s610_s22, 0 }
  0x3d   : > { %p356_p6 = scmp.ne.s32.totalorder %s562_s4, %s355_s8  ;;  %s424_s0 = smov [#allocation6]  }
  0x3e   : > { %166 = vadd.xlane.f32.xlu0 %v165_v4  ;;  %s359_s9 = sshll.u32 %s424_s0, 4  ;;  %s360_s9 = int_to_ptr.vmem [resolvable:$false] %s359_s9 }
  0x3f   : > { %v170_v6 = vstv %s168_s29  ;;  %p357_p12 = pnand %p356_p6, %p615_p11  ;;  %s361_s10 = scalar_lea.vmem %s360_s9, 512 }
  0x40   : > { %p362_p7 = scmp.lt.s32.totalorder %s562_s4, %s360_s9  ;;  %p363_p10 = scmp.lt.s32.totalorder %s361_s10, %s355_s8 }
  0x41   : > { %p358_p13 = pneg %p357_p12 }
  0x42   : > { %p364_p2 = por %p363_p10, %p362_p7 }
  0x44   : > { %p365_p4 = pnand %p364_p2, %p358_p13 }
  0xcb   : > { %v167_v5 = vpop.xlane.xlu0 %166 }
  0xcc   : > { %323 = vrsqrt.f32 %v167_v5 }
  0xd6   : > { %v324_v7 = vpop.eup %323 }
  0xd7   : > { %v171_v8 = vmul.f32 %v324_v7, %v170_v6 }
  0xd9   : > { %v172_v9 = vmul.f32 %v171_v8, %v161_v0  ;;  %v173_v10 = vmul.f32 %v171_v8, %v162_v1 }
  0xdb   : > { %174 = vst [vmem:[%s160_s3] sm:$0xff] %v172_v9  ;;  %175 = vst [vmem:[%s160_s3 + $0x8] sm:$0xff] %v173_v10 }
  0xdc   : > { %368 = shalt.err (!%p365_p4)
}
  0xdd   : > { %s369_s15 = scalar_lea.hbm %s560_s6, 256  ;;  %s373_s20 = scalar_lea.hbm %s606_s2, 512 }
  0xde   : > { %p370_p5 = scmp.ne.s32.totalorder %s560_s6, %s369_s15  ;;  %p374_p0 = scmp.lt.u32.totalorder %s560_s6, %s606_s2 }
  0xdf   : > { %p375_p1 = scmp.lt.u32.totalorder %s373_s20, %s369_s15  ;;  %p377_p6 = scmp.lt.u32.totalorder %s369_s15, %s560_s6 }
  0xe0   : > { %p371_p8 = pnand %p370_p5, %p615_p11 }
  0xe1   : > { %p376_p3 = por %p375_p1, %p374_p0 }
  0xe2   : > { %p372_p9 = pneg %p371_p8 }
  0xe3   : > { %p378_p12 = por %p377_p6, %p376_p3 }
  0xe5   : > { %p379_p13 = pnand %p378_p12, %p372_p9 }
  0xe7   : > { %382 = shalt.err (!%p379_p13)
}
  0xe8   : > { %279 = dma.vmem_to_hbm [thread:$0]  (%p615_p11), %s562_s4, 256, %s560_s6, %s177_s7  }
  0xe9 PF: > { %s203_s26 = sand.u32 1, %s409_s11   ;;  %p616_p7 = scmp.ne.s32.totalorder %s611_s23, 0 }
  0xea   : > { %p617_p10 = scmp.ge.s32.totalorder %s421_s14, 2  ;;  %s204_s27 = scalar_lea.sflag [#allocation5], %s203_s26 }
  0xec   : > { %p286_p2 = pnand %p617_p10, %p616_p7 }
  0xee   : > { %404 = dma.done.wait (!%p286_p2), %s204_s27, 256  }
  0xef   : > { %406 = vsyncadd (!%p286_p2), %s204_s27, 4294967040  ;;  %p16_p4 = scmp.ge.s32.totalorder %s468_s16, 4   ;;  %s618_s11 = smov %s413_s12 }
  0xf0   : > { %s619_s12 = smov %s417_s13  ;;  %s620_s13 = smov %s480_s19 }
  0xf1   : > { %s621_s14 = smov %s468_s16  ;;  %18 = sbr.rel (!%p16_p4) target bundleno = 7 (0x7), region = 73 }
  0xf8   :  { %209 = vsyncpa [#allocation4], 1 }
  0xf9   :  { %211 = vsyncpa [#allocation4 + $0x1], 1 }
  0xfa   :  { %212 = vsyncpa [#allocation5], 1 }
  0xfb   :  { %214 = vsyncpa [#allocation5 + $0x1], 1 }

</bundles_post_ra>
